<compile_context>
chip_gen: v7x
topology: tpu7x:2x2x1
jax: 0.10.0
libtpu: 0.0.40
codegen_flags: <defaults>
</compile_context>

<pallas_src>
import functools

import jax
import jax.numpy as jnp
from jax.experimental import pallas as pl
from jax.experimental.pallas import tpu as pltpu


# ---------------------------------------------------------------------------
# channels_last kernel: x tile (TR, C), normalize each row over the lane axis.
# ---------------------------------------------------------------------------
def _ln_rows_kernel(x_ref, w_ref, b_ref, o_ref, *, eps, inv_c):
    # Params are tiny; cast once per tile (hoisted out of any inner loops).
    w = w_ref[...].astype(jnp.float32)          # (1, C)
    b = b_ref[...].astype(jnp.float32)          # (1, C)
    x = x_ref[...].astype(jnp.float32)          # (TR, C)
    # Single pass over x: both lane reductions issued before centering
    # (mem-bound kernel; the extra VPU work is hidden under the DMA).
    mean = jnp.sum(x, axis=-1, keepdims=True) * inv_c
    ex2 = jnp.sum(x * x, axis=-1, keepdims=True) * inv_c
    # Clamp: E[x^2] - mean^2 can go slightly negative in f32 for near-constant
    # rows (and for garbage rows of the ragged last tile); avoids NaN.
    var = jnp.maximum(ex2 - mean * mean, 0.0)
    inv = jax.lax.rsqrt(var + eps)
    o_ref[...] = ((x - mean) * inv * w + b).astype(o_ref.dtype)


def _pick_row_tile(rows, c, budget_bytes=2 * 1024 * 1024):
    # ~2 MiB of f32 per block; with double-buffered in/out (~4 buffers) this
    # stays well under the default scoped-VMEM limit on every TPU generation
    # (16 MiB on v5e, 32 MiB on v6e/v7x).
    tr = budget_bytes // (4 * max(c, 1))
    tr = max(8, min(1024, (tr // 8) * 8))
    if rows <= tr:
        return rows                      # block == full dim is always legal
    return tr


def _layernorm_rows(x2d, weight, bias, eps):
    """Normalize each row of x2d (rows, C) over the last dim."""
    rows, c = x2d.shape
    tr = _pick_row_tile(rows, c)
    grid = (pl.cdiv(rows, tr),)          # no jnp.pad: ragged last block masked

    w2d = weight.reshape(1, c)
    b2d = bias.reshape(1, c)

    itemsize = jnp.dtype(x2d.dtype).itemsize
    cost = pl.CostEstimate(
        flops=9 * rows * c,
        transcendentals=rows,
        bytes_accessed=2 * rows * c * itemsize + 2 * c * 4,
    )

    # TODO(synk): for C < 128 the output stores are lane-masked; folding several
    # independent rows into the lane axis (segmented in-kernel reduce) would
    # make stores lane-dense, at the cost of an in-kernel relayout.
    return pl.pallas_call(
        functools.partial(_ln_rows_kernel, eps=float(eps), inv_c=1.0 / c),
        out_shape=jax.ShapeDtypeStruct((rows, c), x2d.dtype),
        grid_spec=pltpu.PrefetchScalarGridSpec(
            num_scalar_prefetch=0,
            grid=grid,
            in_specs=[
                pl.BlockSpec((tr, c), lambda i: (i, 0)),
                pl.BlockSpec((1, c), lambda i: (0, 0)),
                pl.BlockSpec((1, c), lambda i: (0, 0)),
            ],
            out_specs=pl.BlockSpec((tr, c), lambda i: (i, 0)),
        ),
        compiler_params=pltpu.CompilerParams(
            dimension_semantics=("parallel",),
        ),
        cost_estimate=cost,
    )(x2d, w2d, b2d)


# ---------------------------------------------------------------------------
# channels_first kernel: x tile (1, C, TS); reduce over C (sublane axis),
# spatial on lanes. No wrapper transposes needed.
# ---------------------------------------------------------------------------
def _ln_chan_kernel(x_ref, w_ref, b_ref, o_ref, *, eps, inv_c):
    w = w_ref[...].astype(jnp.float32)          # (C, 1)
    b = b_ref[...].astype(jnp.float32)          # (C, 1)
    x = x_ref[...].astype(jnp.float32)          # (1, C, TS)
    mean = jnp.sum(x, axis=1, keepdims=True) * inv_c       # (1, 1, TS)
    ex2 = jnp.sum(x * x, axis=1, keepdims=True) * inv_c
    var = jnp.maximum(ex2 - mean * mean, 0.0)
    inv = jax.lax.rsqrt(var + eps)
    y = (x - mean) * inv * w[None] + b[None]
    o_ref[...] = y.astype(o_ref.dtype)


def _pick_spatial_tile(hw, c, budget_bytes=2 * 1024 * 1024):
    ts = budget_bytes // (4 * max(c, 1))
    ts = max(128, min(4096, (ts // 128) * 128))
    if hw <= ts:
        return hw                        # block == full dim is always legal
    return ts


def _layernorm_channels_first(x, weight, bias, eps):
    n, c, h, w = x.shape
    hw = h * w
    x3d = x.reshape(n, c, hw)            # contiguous merge: free, no transpose
    ts = _pick_spatial_tile(hw, c)
    grid = (n, pl.cdiv(hw, ts))          # both axes parallel -> feeds 2 TCs on v7x

    w2d = weight.reshape(c, 1)
    b2d = bias.reshape(c, 1)

    itemsize = jnp.dtype(x.dtype).itemsize
    cost = pl.CostEstimate(
        flops=9 * n * c * hw,
        transcendentals=n * hw,
        bytes_accessed=2 * n * c * hw * itemsize + 2 * c * 4,
    )

    out = pl.pallas_call(
        functools.partial(_ln_chan_kernel, eps=float(eps), inv_c=1.0 / c),
        out_shape=jax.ShapeDtypeStruct((n, c, hw), x.dtype),
        grid_spec=pltpu.PrefetchScalarGridSpec(
            num_scalar_prefetch=0,
            grid=grid,
            in_specs=[
                pl.BlockSpec((1, c, ts), lambda i, j: (i, 0, j)),
                pl.BlockSpec((c, 1), lambda i, j: (0, 0)),
                pl.BlockSpec((c, 1), lambda i, j: (0, 0)),
            ],
            out_specs=pl.BlockSpec((1, c, ts), lambda i, j: (i, 0, j)),
        ),
        compiler_params=pltpu.CompilerParams(
            dimension_semantics=("parallel", "parallel"),
        ),
        cost_estimate=cost,
    )(x3d, w2d, b2d)
    return out.reshape(n, c, h, w)


# ---------------------------------------------------------------------------
# Public wrapper matching the PyTorch module's forward.
# ---------------------------------------------------------------------------
def layer_norm(x, weight, bias, eps=1e-6, data_format="channels_last"):
    """Pallas LayerNorm matching the PyTorch module.

    channels_last : x is (..., C), normalized over the last dim.
    channels_first: x is (N, C, H, W), normalized over dim 1.
    """
    if data_format not in ("channels_last", "channels_first"):
        raise NotImplementedError

    if data_format == "channels_last":
        c = x.shape[-1]
        lead = x.shape[:-1]
        x2d = x.reshape(-1, c)
        out = _layernorm_rows(x2d, weight, bias, eps)
        return out.reshape(*lead, c)
    else:
        return _layernorm_channels_first(x, weight, bias, eps)


def _reference_layer_norm(x, weight, bias, eps, data_format):
    if data_format == "channels_last":
        mean = jnp.mean(x, axis=-1, keepdims=True)
        var = jnp.mean((x - mean) ** 2, axis=-1, keepdims=True)
        return (x - mean) / jnp.sqrt(var + eps) * weight + bias
    else:
        mean = jnp.mean(x, axis=1, keepdims=True)
        var = jnp.mean((x - mean) ** 2, axis=1, keepdims=True)
        xn = (x - mean) / jnp.sqrt(var + eps)
        return weight[None, :, None, None] * xn + bias[None, :, None, None]


if __name__ == "__main__":
    key = jax.random.PRNGKey(0)
    k1, k2 = jax.random.split(key)

    # --- channels_first: NCHW input (ConvNeXt downsample/stem path) ---
    n, c, h, w = 2, 4, 16, 16
    x_cf = jax.random.normal(k1, (n, c, h, w), dtype=jnp.float32)
    weight_cf = jnp.ones((c,), dtype=jnp.float32)   # nn.Parameter(ones(C))
    bias_cf = jnp.zeros((c,), dtype=jnp.float32)    # nn.Parameter(zeros(C))
    out_cf = layer_norm(x_cf, weight_cf, bias_cf, eps=1e-6,
                        data_format="channels_first")
    out_cf = jax.block_until_ready(out_cf)
    ref_cf = _reference_layer_norm(x_cf, weight_cf, bias_cf, 1e-6,
                                   "channels_first")
    assert jnp.allclose(out_cf, ref_cf, atol=1e-5, rtol=1e-5), "channels_first mismatch"

    # --- channels_last: (N, H, W, C) input ---
    c2 = 32
    x_cl = jax.random.normal(k2, (2, 8, 8, c2), dtype=jnp.float32)
    weight_cl = jnp.ones((c2,), dtype=jnp.float32)
    bias_cl = jnp.zeros((c2,), dtype=jnp.float32)
    out_cl = layer_norm(x_cl, weight_cl, bias_cl, eps=1e-6,
                        data_format="channels_last")
    out_cl = jax.block_until_ready(out_cl)
    ref_cl = _reference_layer_norm(x_cl, weight_cl, bias_cl, 1e-6,
                                   "channels_last")
    assert jnp.allclose(out_cl, ref_cl, atol=1e-5, rtol=1e-5), "channels_last mismatch"

    print("KERNEL_OK")
</pallas_src>

<mosaic_0001>
module attributes {stable_mosaic.version = 11 : i64} {
  func.func @_ln_chan_kernel(%arg0: i32, %arg1: i32, %arg2: memref<1x4x256xf32, #tpu.memory_space<vmem>>, %arg3: memref<4x1xf32, #tpu.memory_space<vmem>>, %arg4: memref<4x1xf32, #tpu.memory_space<vmem>>, %arg5: memref<1x4x256xf32, #tpu.memory_space<vmem>>) attributes {dimension_semantics = [#tpu.dimension_semantics<parallel>, #tpu.dimension_semantics<parallel>], iteration_bounds = array<i64: 2, 1>, scalar_prefetch = 0 : i64, scratch_operands = 0 : i64, tpu.core_type = #tpu.core_type<tc>, window_params = [{transform_indices = @transform_0, window_bounds = array<i64: 1, 4, 256>}, {pipeline_mode = #tpu.pipeline_mode<synchronous>, transform_indices = @transform_1, window_bounds = array<i64: 4, 1>}, {pipeline_mode = #tpu.pipeline_mode<synchronous>, transform_indices = @transform_2, window_bounds = array<i64: 4, 1>}, {transform_indices = @transform_3, window_bounds = array<i64: 1, 4, 256>}]} {
    %c0 = arith.constant 0 : index
    %c0_0 = arith.constant 0 : index
    %0 = vector.load %arg3[%c0, %c0_0] : memref<4x1xf32, #tpu.memory_space<vmem>>, vector<4x1xf32>
    %c0_1 = arith.constant 0 : index
    %c0_2 = arith.constant 0 : index
    %1 = vector.load %arg4[%c0_1, %c0_2] : memref<4x1xf32, #tpu.memory_space<vmem>>, vector<4x1xf32>
    %c0_3 = arith.constant 0 : index
    %c0_4 = arith.constant 0 : index
    %c0_5 = arith.constant 0 : index
    %2 = vector.load %arg2[%c0_3, %c0_4, %c0_5] : memref<1x4x256xf32, #tpu.memory_space<vmem>>, vector<1x4x256xf32>
    %cst = arith.constant dense<0.000000e+00> : vector<1x256xf32>
    %3 = vector.multi_reduction <add>, %2, %cst [1] : vector<1x4x256xf32> to vector<1x256xf32>
    %4 = vector.shape_cast %3 : vector<1x256xf32> to vector<1x1x256xf32>
    %cst_6 = arith.constant 2.500000e-01 : f32
    %5 = vector.broadcast %cst_6 : f32 to vector<1x1x256xf32>
    %6 = arith.mulf %4, %5 : vector<1x1x256xf32>
    %7 = arith.mulf %2, %2 : vector<1x4x256xf32>
    %cst_7 = arith.constant dense<0.000000e+00> : vector<1x256xf32>
    %8 = vector.multi_reduction <add>, %7, %cst_7 [1] : vector<1x4x256xf32> to vector<1x256xf32>
    %9 = vector.shape_cast %8 : vector<1x256xf32> to vector<1x1x256xf32>
    %cst_8 = arith.constant 2.500000e-01 : f32
    %10 = vector.broadcast %cst_8 : f32 to vector<1x1x256xf32>
    %11 = arith.mulf %9, %10 : vector<1x1x256xf32>
    %12 = arith.mulf %6, %6 : vector<1x1x256xf32>
    %13 = arith.subf %11, %12 : vector<1x1x256xf32>
    %cst_9 = arith.constant 0.000000e+00 : f32
    %14 = vector.broadcast %cst_9 : f32 to vector<1x1x256xf32>
    %15 = arith.maximumf %13, %14 : vector<1x1x256xf32>
    %cst_10 = arith.constant 9.99999997E-7 : f32
    %16 = vector.broadcast %cst_10 : f32 to vector<1x1x256xf32>
    %17 = arith.addf %15, %16 : vector<1x1x256xf32>
    %18 = math.rsqrt %17 : vector<1x1x256xf32>
    %19 = vector.broadcast %6 : vector<1x1x256xf32> to vector<1x4x256xf32>
    %20 = arith.subf %2, %19 : vector<1x4x256xf32>
    %21 = vector.broadcast %18 : vector<1x1x256xf32> to vector<1x4x256xf32>
    %22 = arith.mulf %20, %21 : vector<1x4x256xf32>
    %23 = vector.shape_cast %0 : vector<4x1xf32> to vector<1x4x1xf32>
    %24 = vector.broadcast %23 : vector<1x4x1xf32> to vector<1x4x256xf32>
    %25 = arith.mulf %22, %24 : vector<1x4x256xf32>
    %26 = vector.shape_cast %1 : vector<4x1xf32> to vector<1x4x1xf32>
    %27 = vector.broadcast %26 : vector<1x4x1xf32> to vector<1x4x256xf32>
    %28 = arith.addf %25, %27 : vector<1x4x256xf32>
    %c0_11 = arith.constant 0 : index
    %c0_12 = arith.constant 0 : index
    %c0_13 = arith.constant 0 : index
    %29 = vector.load %arg5[%c0_11, %c0_12, %c0_13] : memref<1x4x256xf32, #tpu.memory_space<vmem>>, vector<1x4x256xf32>
    tpu.vector_store %arg5[%c0_11, %c0_12, %c0_13], %28 {strides = array<i32>} : memref<1x4x256xf32, #tpu.memory_space<vmem>>, vector<1x4x256xf32>,
    return
  }
  func.func @transform_0(%arg0: i32, %arg1: i32) -> (i32, i32, i32) {
    %c0_i32 = arith.constant 0 : i32
    %c0_i32_0 = arith.constant 0 : i32
    return %arg0, %c0_i32, %arg1 : i32, i32, i32
  }
  func.func @transform_1(%arg0: i32, %arg1: i32) -> (i32, i32) {
    %c0_i32 = arith.constant 0 : i32
    %c0_i32_0 = arith.constant 0 : i32
    %c0_i32_1 = arith.constant 0 : i32
    return %c0_i32, %c0_i32_0 : i32, i32
  }
  func.func @transform_2(%arg0: i32, %arg1: i32) -> (i32, i32) {
    %c0_i32 = arith.constant 0 : i32
    %c0_i32_0 = arith.constant 0 : i32
    %c0_i32_1 = arith.constant 0 : i32
    return %c0_i32, %c0_i32_0 : i32, i32
  }
  func.func @transform_3(%arg0: i32, %arg1: i32) -> (i32, i32, i32) {
    %c0_i32 = arith.constant 0 : i32
    %c0_i32_0 = arith.constant 0 : i32
    return %arg0, %c0_i32, %arg1 : i32, i32, i32
  }
}

</mosaic_0001>

<bundles_post_ra>
// kernel: tpu_custom_call.1
= control target key start
LH: loop header
LB: loop body
LE: loop exit
PB: predicated region body
PF: predicated region fallthrough
CT: control target
= control target key end

     0   :  { %8 = vsyncpa [#allocation3], 0  ;;  %s805_s0 = inlined_call_operand.hbm [shape: f32[2,4,256], index: 0, kind: input, shape index: {}]   ;;  %s806_s1 = inlined_call_operand.vmem [shape: f32[4,1], index: 1, kind: input, shape index: {}]   ;;  %s807_s2 = inlined_call_operand.vmem [shape: f32[4,1], index: 2, kind: input, shape index: {}]   ;;  %s808_s3 = inlined_call_operand.hbm [shape: f32[2,4,256], index: 3, kind: output, shape index: {}]  }
   0x1   :  { %10 = vsyncpa [#allocation3 + $0x1], 0 }
   0x2   :  { %11 = vsyncpa [#allocation4], 0 }
   0x3   :  { %13 = vsyncpa [#allocation4 + $0x1], 0  ;;  %s623_s12 = smov 0   ;;  %s625_s13 = smov 0  }
   0x4   :  { %s627_s14 = smov 0   ;;  %s629_s15 = smov 0  }
   0x5   :  { %s631_s16 = smov 0   ;;  %s633_s17 = smov 0  }
   0x6 LB: > { %s398_s18 = sadd.s32 4294967295, %s597_s17   ;;  %s399_s19 = sadd.s32 4294967294, %s597_s17   ;;  %s597_s17 = sphi %s633_s17, %s19_s17   ;;  %s593_s16 = sphi %s631_s16, %s824_s16   ;;  %s589_s15 = sphi %s629_s15, %s823_s15   ;;  %s585_s14 = sphi %s627_s14, %s822_s14   ;;  %s581_s13 = sphi %s625_s13, %s821_s13   ;;  %s577_s12 = sphi %s623_s12, %s820_s12  }
   0x7   : > { %s31_s20 = sadd.s32 1, %s593_s16  ;;  %s40_s21 = sadd.s32 1, %s585_s14 }
   0x8   : > { %p33_p0 = scmp.ge.s32.totalorder %s31_s20, 2  ;;  %p47_p1 = scmp.ne.s32.totalorder %s585_s14, %s581_s13 }
   0x9   : > { %p48_p2 = scmp.eq.s32.totalorder %s597_s17, 0  ;;  %p53_p3 = scmp.ne.s32.totalorder %s581_s13, %s577_s12 }
   0xa   : > { %s826_s20 = smov (%p33_p0, %s31_s20), 0  ;;  %p54_p5 = scmp.eq.s32.totalorder %s398_s18, 0 }
   0xb   : > { %p664_p4 = por %p48_p2, %p47_p1  ;;  %s35_s23 = ssub.s32 %s593_s16, %s826_s20 }
   0xc   : > { %p121_p6 = scmp.eq.s32.totalorder %s398_s18, 1  ;;  %p38_p7 = scmp.eq.s32.totalorder %s35_s23, 0 }
   0xd   : > { %p670_p8 = por %p54_p5, %p53_p3  ;;  %p127_p10 = scmp.eq.s32.totalorder %s399_s19, 1 }
   0xe   : > { %p674_p9 = por %p121_p6, %p47_p1  ;;  %p427_p13 = scmp.lt.s32.totalorder %s597_s17, 2 }
   0xf   : > { %s679_s26 = scalar_select %p38_p7, %s585_s14, %s40_s21  }
  0x10   : > { %s812_s25 = scalar_select %p674_p9, 1, 0 }
  0x11   : > { %p681_p11 = por %p127_p10, %p53_p3  ;;  %s153_s28 = sand.u32 1, %s585_s14  }
  0x12   : > { %s402_s29 = sshll.u32 %s153_s28, 3  ;;  %s413_s30 = sshll.u32 %s593_s16, 7 }
  0x13   : > { %s813_s27 = scalar_select %p681_p11, 1, 0 }
  0x14   : > { %s692_s6 = scalar_lea.hbm %s805_s0, %s413_s30  ;;  %s157_s7 = scalar_lea.vmem [#allocation2], %s402_s29 }
  0x15   : > { %s167_s8 = sshll.u32 %s157_s7, 4  ;;  %p698_p0 = pnand %p427_p13, %p664_p4  ;;  %s694_s8 = int_to_ptr.vmem [resolvable:$true] %s167_s8 }
  0x16   : > { %s154_s10 = scalar_lea.sflag [#allocation3], %s153_s28  ;;  %s485_s11 = scalar_lea.hbm %s692_s6, 128 }
  0x17   : > { %p486_p3 = scmp.ne.s32.totalorder %s692_s6, %s485_s11  ;;  %p487_p5 = pneg %p698_p0 }
  0x18   : > { %s490_s21 = scalar_lea.hbm %s805_s0, 256  ;;  %p491_p4 = scmp.lt.u32.totalorder %s692_s6, %s805_s0 }
  0x19   : > { %p488_p6 = pnand %p487_p5, %p486_p3  ;;  %p492_p10 = scmp.lt.u32.totalorder %s490_s21, %s485_s11 }
  0x1a   : > { %p494_p12 = scmp.lt.u32.totalorder %s485_s11, %s692_s6 }
  0x1b   : > { %p489_p7 = pneg %p488_p6  ;;  %p493_p13 = por %p492_p10, %p491_p4 }
  0x1d   : > { %p495_p1 = por %p494_p12, %p493_p13 }
  0x1f   : > { %p496_p2 = pnand %p495_p1, %p489_p7 }
  0x21   : > { %499 = shalt.err (!%p496_p2)
}
  0x22   : > { %s500_s28 = scalar_lea.vmem %s694_s8, 128  ;;  %s599_s29 = smov [#allocation2]  }
  0x23   : > { %p501_p3 = scmp.ne.s32.totalorder %s694_s8, %s500_s28  ;;  %s505_s30 = sshll.u32 %s599_s29, 4  ;;  %s506_s30 = int_to_ptr.vmem [resolvable:$false] %s505_s30 }
  0x24   : > { %s507_s4 = scalar_lea.vmem %s506_s30, 256  ;;  %p508_p9 = scmp.lt.s32.totalorder %s694_s8, %s506_s30 }
  0x25   : > { %p503_p6 = pnand %p501_p3, %p487_p5  ;;  %p509_p4 = scmp.lt.s32.totalorder %s507_s4, %s500_s28 }
  0x27   : > { %p504_p11 = pneg %p503_p6  ;;  %p510_p10 = por %p509_p4, %p508_p9 }
  0x29   : > { %p511_p12 = pnand %p510_p10, %p504_p11 }
  0x2b   : > { %514 = shalt.err (!%p511_p12)
}
  0x2c   : > { %422 = dma.hbm_to_vmem [thread:$0]  (!%p698_p0), %s692_s6, 128, %s694_s8, %s154_s10  }
  0x2d   : > { %p815_p1 = scmp.lt.s32.totalorder %s597_s17, 3  ;;  %p816_p2 = scmp.ge.s32.totalorder %s597_s17, 1 }
  0x2f   : > { %p173_p5 = pnand %p816_p2, %p815_p1 }
  0x30   : > { %s734_s5 = sand.u32 (!%p173_p5), 1, %s581_s13  }
  0x31   : > { %176 = sbr.rel (%p173_p5) target bundleno = 209 (0xd1), region = 32  ;;  %s406_s7 = sshll.u32 (!%p173_p5), %s734_s5, 3 }
  0x32   : > { %s179_s11 = scalar_lea.sflag (!%p173_p5), [#allocation3], %s734_s5  ;;  %s182_s9 = scalar_lea.vmem (!%p173_p5), [#allocation2], %s406_s7 }
  0x38   : > { %568 = dma.done.wait (%p670_p8), %s179_s11, 128  }
  0x39   : > { %570 = vsyncadd (%p670_p8), %s179_s11, 4294967168  ;;  %v600_v0 = vmov 0   ;;  %v207_v1 = vld [vmem:[%s806_s1] sm:$0xf]  ;;  %vm213_vm0 = vcmask 1043456   ;;  %v277_v49 = vlaneseq  ;;  %s414_s24 = sshll.u32 %s589_s15, 7 }
  0x3a   : > { %479 = vset.pattern.permute.xlu0 %v600_v0  ;;  %v208_v2 = vld [vmem:[%s807_s2] sm:$0xf]  ;;  %v601_v47 = vmov 839922192   ;;  %s204_s19 = scalar_lea.vmem [#allocation5], %s406_s7  ;;  %s756_s28 = scalar_lea.hbm %s808_s3, %s414_s24 }
  0x3b   : > { %272 = vperm.xlu0 %479, %v207_v1   ;;  %v209_v3 = vld [vmem:[%s182_s9] sm:$0xff]  ;;  %v275_v48 = vunpack.c.l.s4 %v601_v47  ;;  %v278_v53 = vshrl.u32 %v277_v49, 7  ;;  %s314_s21 = sshll.u32 %s204_s19, 4  ;;  %s298_s29 = scalar_lea.sflag [#allocation4], %s734_s5  ;;  %s758_s21 = int_to_ptr.vmem [resolvable:$true] %s314_s21 }
  0x3c   : > { %v211_v4 = vcombine.high %v209_v3, %v209_v3  ;;  %v230_v5 = vmul.f32 %v209_v3, %v209_v3  ;;  %v214_v6 = vsel %vm213_vm0, %v209_v3, 0.0  ;;  %s515_s30 = scalar_lea.vmem %s758_s21, 128  ;;  %p817_p9 = scmp.ne.s32.totalorder %s812_s25, 0 }
  0x3d   : > { %v215_v9 = vrot.slane %v214_v6, 4  ;;  %v276_v52 = vunpack.c.0.s8 %v275_v48  ;;  %p516_p8 = scmp.ne.s32.totalorder %s758_s21, %s515_s30  ;;  %s602_s15 = smov [#allocation5]  }
  0x3e   : > { %v221_v7 = vsel %vm213_vm0, %v211_v4, 0.0  ;;  %v232_v8 = vcombine.high %v230_v5, %v230_v5  ;;  %v234_v11 = vsel %vm213_vm0, %v230_v5, 0.0  ;;  %s519_s4 = sshll.u32 %s602_s15, 4  ;;  %s520_s4 = int_to_ptr.vmem [resolvable:$false] %s519_s4 }
  0x3f   : > { %285 = vperm.xlu0 %479, %v208_v2   ;;  %v222_v10 = vrot.slane %v221_v7, 4  ;;  %v216_v13 = vadd.f32 %v215_v9, %v214_v6  ;;  %v235_v14 = vrot.slane %v234_v11, 4  ;;  %v279_v57 = vsub.s32 %v276_v52, %v278_v53  ;;  %p517_p11 = pnand %p516_p8, %p817_p9  ;;  %s521_s7 = scalar_lea.vmem %s520_s4, 256 }
  0x40   : > { %v241_v12 = vsel %vm213_vm0, %v232_v8, 0.0  ;;  %p522_p7 = scmp.lt.s32.totalorder %s758_s21, %s520_s4  ;;  %p523_p13 = scmp.lt.s32.totalorder %s521_s7, %s515_s30 }
  0x41   : > { %v223_v15 = vadd.f32 %v222_v10, %v221_v7  ;;  %v242_v16 = vrot.slane %v241_v12, 4  ;;  %v217_v17 = vrot.slane %v216_v13, 2  ;;  %v236_v18 = vadd.f32 %v235_v14, %v234_v11  ;;  %p518_p0 = pneg %p517_p11 }
  0x42   : > { %p524_p3 = por %p523_p13, %p522_p7 }
  0x43   : > { %v224_v19 = vrot.slane %v223_v15, 2  ;;  %v243_v20 = vadd.f32 %v242_v16, %v241_v12  ;;  %v218_v21 = vadd.f32 %v217_v17, %v216_v13  ;;  %v237_v22 = vrot.slane %v236_v18, 2 }
  0x44   : > { %p525_p6 = pnand %p524_p3, %p518_p0 }
  0x45   : > { %v225_v23 = vadd.f32 %v224_v19, %v223_v15  ;;  %v244_v24 = vrot.slane %v243_v20, 2  ;;  %v219_v25 = vrot.slane %v218_v21, 1  ;;  %v238_v26 = vadd.f32 %v237_v22, %v236_v18 }
  0x47   : > { %v226_v27 = vrot.slane %v225_v23, 1  ;;  %v245_v28 = vadd.f32 %v244_v24, %v243_v20  ;;  %v220_v29 = vadd.f32 %v219_v25, %v218_v21  ;;  %v239_v30 = vrot.slane %v238_v26, 1 }
  0x49   : > { %v227_v31 = vadd.f32 %v226_v27, %v225_v23  ;;  %v246_v32 = vrot.slane %v245_v28, 1  ;;  %v228_v33 = vmul.f32 0.25, %v220_v29  ;;  %v240_v34 = vadd.f32 %v239_v30, %v238_v26 }
  0x4b   : > { %v229_v35 = vmul.f32 0.25, %v227_v31  ;;  %v247_v36 = vadd.f32 %v246_v32, %v245_v28  ;;  %v248_v37 = vmul.f32 0.25, %v240_v34  ;;  %v250_v38 = vmul.f32 %v228_v33, %v228_v33 }
  0x4d   : > { %v249_v39 = vmul.f32 0.25, %v247_v36  ;;  %v251_v40 = vmul.f32 %v229_v35, %v229_v35  ;;  %v252_v41 = vsub.f32 %v248_v37, %v250_v38  ;;  %v262_v51 = vcombine.low %v228_v33, %v229_v35 }
  0x4f   : > { %v253_v42 = vsub.f32 %v249_v39, %v251_v40  ;;  %v254_v43 = vmax.f32 %v252_v41, 0.0  ;;  %v264_v55 = vsub.f32 %v209_v3, %v262_v51 }
  0x51   : > { %v255_v44 = vmax.f32 %v253_v42, 0.0  ;;  %v256_v45 = vadd.f32 1e-06, %v254_v43 }
  0x53   : > { %v257_v46 = vadd.f32 1e-06, %v255_v44  ;;  %481 = vrsqrt.f32 %v256_v45 }
  0x55   : > { %483 = vrsqrt.f32 %v257_v46 }
  0x5d   : > { %v482_v50 = vpop.eup %481 }
  0x5f   : > { %v484_v54 = vpop.eup %483 }
  0x60   : > { %v267_v56 = vcombine.low %v482_v50, %v484_v54 }
  0x62   : > { %v269_v59 = vmul.f32 %v267_v56, %v264_v55 }
  0xba   : > { %v273_v58 = vpop.permute.xlu0 %272 }
  0xbb   : > { %v280_v60 = vrot.slane %v273_v58, %v279_v57 }
  0xbd   : > { %v282_v62 = vmul.f32 %v280_v60, %v269_v59 }
  0xbe   : > { %v286_v61 = vpop.permute.xlu0 %285 }
  0xbf   : > { %v293_v63 = vrot.slane %v286_v61, %v279_v57 }
  0xc1   : > { %v295_v0 = vadd.f32 %v293_v63, %v282_v62 }
  0xc3   : > { %296 = vst [vmem:[%s204_s19] sm:$0xff] %v295_v0 }
  0xc4   : > { %528 = shalt.err (!%p525_p6)
}
  0xc5   : > { %s529_s5 = scalar_lea.hbm %s756_s28, 128  ;;  %s533_s6 = scalar_lea.hbm %s808_s3, 256 }
  0xc6   : > { %p530_p4 = scmp.ne.s32.totalorder %s756_s28, %s529_s5  ;;  %p534_p1 = scmp.lt.u32.totalorder %s756_s28, %s808_s3 }
  0xc7   : > { %p535_p2 = scmp.lt.u32.totalorder %s533_s6, %s529_s5  ;;  %p537_p8 = scmp.lt.u32.totalorder %s529_s5, %s756_s28 }
  0xc8   : > { %p531_p10 = pnand %p530_p4, %p817_p9 }
  0xc9   : > { %p536_p5 = por %p535_p2, %p534_p1 }
  0xca   : > { %p532_p12 = pneg %p531_p10 }
  0xcb   : > { %p538_p11 = por %p537_p8, %p536_p5 }
  0xcd   : > { %p539_p0 = pnand %p538_p11, %p532_p12 }
  0xcf   : > { %542 = shalt.err (!%p539_p0)
}
  0xd0   : > { %417 = dma.vmem_to_hbm [thread:$0]  (%p817_p9), %s758_s21, 128, %s756_s28, %s298_s29  }
  0xd1 PF: > { %s326_s18 = sand.u32 1, %s577_s12   ;;  %p818_p7 = scmp.ne.s32.totalorder %s813_s27, 0 }
  0xd2   : > { %p819_p13 = scmp.ge.s32.totalorder %s597_s17, 2  ;;  %s327_s24 = scalar_lea.sflag [#allocation4], %s326_s18 }
  0xd4   : > { %p424_p3 = pnand %p819_p13, %p818_p7 }
  0xd6   : > { %572 = dma.done.wait (!%p424_p3), %s327_s24, 128  }
  0xd7   : > { %574 = vsyncadd (!%p424_p3), %s327_s24, 4294967168  ;;  %s19_s17 = sadd.s32 1, %s597_s17   ;;  %s820_s12 = smov %s581_s13 }
  0xd8   : > { %p16_p6 = scmp.ge.s32.totalorder %s19_s17, 4   ;;  %s821_s13 = smov %s585_s14 }
  0xd9   : > { %s822_s14 = smov %s679_s26  ;;  %s823_s15 = smov %s593_s16 }
  0xda   : > { %s824_s16 = smov %s826_s20  ;;  %18 = sbr.rel (!%p16_p6) target bundleno = 6 (0x6), region = 77 }
  0xe1   :  { %332 = vsyncpa [#allocation3], 1 }
  0xe2   :  { %334 = vsyncpa [#allocation3 + $0x1], 1 }
  0xe3   :  { %335 = vsyncpa [#allocation4], 1 }
  0xe4   :  { %337 = vsyncpa [#allocation4 + $0x1], 1 }

</bundles_post_ra>
